<compile_context>
chip_gen: v7x
topology: tpu7x:2x2x1
jax: 0.10.0
libtpu: 0.0.40
codegen_flags: <defaults>
</compile_context>

<pallas_src>
import jax
import jax.numpy as jnp
from jax.experimental import pallas as pl
from jax.experimental.pallas import tpu as pltpu

INPUT_DIM = 32
LATENT_DIM = 32
COND_DIM = 32
HIDDEN = 128
PACKED = INPUT_DIM + 3 * LATENT_DIM  # 128 lanes: [x_hat | mu | logvar | z]


def cvae_kernel(x_ref, y_ref, eps_ref,
                w1x_ref, w1y_ref, b1_ref,
                w2mu_ref, b2mu_ref, w2lv_ref, b2lv_ref,
                w3z_ref, w3y_ref, b3_ref,
                w4_ref, b4_ref,
                out_ref):
    x = x_ref[...]
    y = y_ref[...]
    eps = eps_ref[...]

    # ---- Encoder (split contraction instead of lane-axis concat) ----
    h = jnp.dot(x, w1x_ref[...], preferred_element_type=jnp.float32)
    h = h + jnp.dot(y, w1y_ref[...], preferred_element_type=jnp.float32)
    h = jnp.maximum(h + b1_ref[...], 0.0)                              # relu

    # mu / logvar as two narrow matmuls (no lane-slice of a fused enc_out)
    mu = jnp.dot(h, w2mu_ref[...], preferred_element_type=jnp.float32) + b2mu_ref[...]
    logvar = jnp.dot(h, w2lv_ref[...], preferred_element_type=jnp.float32) + b2lv_ref[...]

    # ---- Reparametrize (f32, EUP exp) ----
    std = jnp.exp(0.5 * logvar)
    z = std * eps + mu

    # ---- Decoder (split contraction instead of lane-axis concat) ----
    h2 = jnp.dot(z, w3z_ref[...], preferred_element_type=jnp.float32)
    h2 = h2 + jnp.dot(y, w3y_ref[...], preferred_element_type=jnp.float32)
    h2 = jnp.maximum(h2 + b3_ref[...], 0.0)                            # relu
    x_hat = jnp.dot(h2, w4_ref[...], preferred_element_type=jnp.float32) + b4_ref[...]

    # ---- Lane-dense packed output: one 128-lane store + one HBM writeback stream ----
    out_ref[...] = jnp.concatenate([x_hat, mu, logvar, z], axis=-1)


def cvae_forward(x, y, eps, params, *, tile_b=512):
    """Full CVAE forward pass.

    x:   [B, INPUT_DIM]  float32
    y:   [B, COND_DIM]   float32
    eps: [B, LATENT_DIM] float32  (pre-sampled standard normal for reparametrization)
    """
    B = x.shape[0]
    w1, b1, w2, b2, w3, b3, w4, b4 = params

    # Split weights once on the host side (keeps the PyTorch-shaped param pytree).
    w1x, w1y = w1[:INPUT_DIM, :], w1[INPUT_DIM:, :]          # [32,128] each
    w2_mu, w2_lv = w2[:, :LATENT_DIM], w2[:, LATENT_DIM:]    # [128,32] each
    b2_mu, b2_lv = b2[:, :LATENT_DIM], b2[:, LATENT_DIM:]    # [1,32] each
    w3z, w3y = w3[:LATENT_DIM, :], w3[LATENT_DIM:, :]        # [32,128] each

    # Batch tile: multiple of 8 sublanes (f32); pad B up so the grid tiles evenly.
    TB = min(tile_b, max(8, ((B + 7) // 8) * 8))
    TB = ((TB + 7) // 8) * 8
    padded_B = ((B + TB - 1) // TB) * TB
    if padded_B != B:
        pad = padded_B - B
        x = jnp.pad(x, ((0, pad), (0, 0)))
        y = jnp.pad(y, ((0, pad), (0, 0)))
        eps = jnp.pad(eps, ((0, pad), (0, 0)))

    grid = (padded_B // TB,)

    def batch_spec(feat):
        return pl.BlockSpec((TB, feat), lambda i: (i, 0))

    def resident_spec(shape):
        # Same block every grid step -> weight/bias stays resident in VMEM.
        return pl.BlockSpec(shape, lambda i: (0, 0))

    flops_per_row = 2 * (2 * INPUT_DIM * HIDDEN        # x@w1x + y@w1y
                         + 2 * HIDDEN * LATENT_DIM     # mu + logvar
                         + 2 * LATENT_DIM * HIDDEN     # z@w3z + y@w3y
                         + HIDDEN * INPUT_DIM)         # x_hat
    cost = pl.CostEstimate(
        flops=padded_B * flops_per_row,
        transcendentals=padded_B * LATENT_DIM,
        bytes_accessed=4 * padded_B * (INPUT_DIM + COND_DIM + LATENT_DIM + PACKED),
    )

    packed = pl.pallas_call(
        cvae_kernel,
        out_shape=jax.ShapeDtypeStruct((padded_B, PACKED), jnp.float32),
        grid=grid,
        in_specs=[
            batch_spec(INPUT_DIM),                      # x
            batch_spec(COND_DIM),                       # y
            batch_spec(LATENT_DIM),                     # eps
            resident_spec((INPUT_DIM, HIDDEN)),         # w1x
            resident_spec((COND_DIM, HIDDEN)),          # w1y
            resident_spec((1, HIDDEN)),                 # b1
            resident_spec((HIDDEN, LATENT_DIM)),        # w2_mu
            resident_spec((1, LATENT_DIM)),             # b2_mu
            resident_spec((HIDDEN, LATENT_DIM)),        # w2_lv
            resident_spec((1, LATENT_DIM)),             # b2_lv
            resident_spec((LATENT_DIM, HIDDEN)),        # w3z
            resident_spec((COND_DIM, HIDDEN)),          # w3y
            resident_spec((1, HIDDEN)),                 # b3
            resident_spec((HIDDEN, INPUT_DIM)),         # w4
            resident_spec((1, INPUT_DIM)),              # b4
        ],
        out_specs=pl.BlockSpec((TB, PACKED), lambda i: (i, 0)),
        compiler_params=pltpu.CompilerParams(
            dimension_semantics=("parallel",)),
        cost_estimate=cost,
    )(x, y, eps,
      w1x, w1y, b1, w2_mu, b2_mu, w2_lv, b2_lv, w3z, w3y, b3, w4, b4)

    # Unpack (zero-cost XLA slices) and drop any padded rows.
    x_hat = packed[:B, 0:INPUT_DIM]
    mu = packed[:B, INPUT_DIM:INPUT_DIM + LATENT_DIM]
    logvar = packed[:B, INPUT_DIM + LATENT_DIM:INPUT_DIM + 2 * LATENT_DIM]
    z = packed[:B, INPUT_DIM + 2 * LATENT_DIM:PACKED]

    # .view(-1, *input_shape) with input_shape=(32,) is a no-op reshape here.
    x_hat = x_hat.reshape(-1, INPUT_DIM)
    return x_hat, mu, logvar, z


def init_params(key):
    """Deterministic parameter init (shapes match the PyTorch module, stored [in, out])."""
    ks = jax.random.split(key, 8)

    def lin(kw, kb, fan_in, fan_out):
        bound = 1.0 / jnp.sqrt(fan_in)
        w = jax.random.uniform(kw, (fan_in, fan_out), jnp.float32, -bound, bound)
        b = jax.random.uniform(kb, (1, fan_out), jnp.float32, -bound, bound)
        return w, b

    # Encoder: fc1 (in+cond -> 128), fc2 (128 -> 2*latent)
    w1, b1 = lin(ks[0], ks[1], INPUT_DIM + COND_DIM, HIDDEN)
    w2, b2 = lin(ks[2], ks[3], HIDDEN, 2 * LATENT_DIM)
    # Decoder: rev_fc2 (latent+cond -> 128), rev_fc1 (128 -> input_dim)
    w3, b3 = lin(ks[4], ks[5], LATENT_DIM + COND_DIM, HIDDEN)
    w4, b4 = lin(ks[6], ks[7], HIDDEN, INPUT_DIM)
    return (w1, b1, w2, b2, w3, b3, w4, b4)


if __name__ == "__main__":
    key = jax.random.PRNGKey(0)
    k_x, k_y, k_eps, k_p = jax.random.split(key, 4)

    B = 8
    x = jax.random.normal(k_x, (B, INPUT_DIM), jnp.float32)
    y = jax.random.normal(k_y, (B, COND_DIM), jnp.float32)
    eps = jax.random.normal(k_eps, (B, LATENT_DIM), jnp.float32)  # reparam noise
    params = init_params(k_p)

    x_hat, mu, logvar, z = cvae_forward(x, y, eps, params)
    jax.block_until_ready((x_hat, mu, logvar, z))

    # Sanity check against a pure-JAX reference (PyTorch-equivalent math).
    w1, b1, w2, b2, w3, b3, w4, b4 = params
    xc = jnp.concatenate([x, y], axis=-1)
    h = jnp.maximum(xc @ w1 + b1, 0.0)
    enc = h @ w2 + b2
    mu_r, logvar_r = enc[:, :LATENT_DIM], enc[:, LATENT_DIM:]
    z_r = jnp.exp(0.5 * logvar_r) * eps + mu_r
    zc = jnp.concatenate([z_r, y], axis=-1)
    h2 = jnp.maximum(zc @ w3 + b3, 0.0)
    xhat_r = h2 @ w4 + b4

    assert jnp.allclose(x_hat, xhat_r, atol=1e-5)
    assert jnp.allclose(mu, mu_r, atol=1e-5)
    assert jnp.allclose(logvar, logvar_r, atol=1e-5)
    assert jnp.allclose(z, z_r, atol=1e-5)
    print("KERNEL_OK")
</pallas_src>

<mosaic_0001>
module attributes {stable_mosaic.version = 11 : i64} {
  func.func @cvae_kernel(%arg0: i32, %arg1: memref<8x32xf32, #tpu.memory_space<vmem>>, %arg2: memref<8x32xf32, #tpu.memory_space<vmem>>, %arg3: memref<8x32xf32, #tpu.memory_space<vmem>>, %arg4: memref<32x128xf32, #tpu.memory_space<vmem>>, %arg5: memref<32x128xf32, #tpu.memory_space<vmem>>, %arg6: memref<1x128xf32, #tpu.memory_space<vmem>>, %arg7: memref<128x32xf32, #tpu.memory_space<vmem>>, %arg8: memref<1x32xf32, #tpu.memory_space<vmem>>, %arg9: memref<128x32xf32, #tpu.memory_space<vmem>>, %arg10: memref<1x32xf32, #tpu.memory_space<vmem>>, %arg11: memref<32x128xf32, #tpu.memory_space<vmem>>, %arg12: memref<32x128xf32, #tpu.memory_space<vmem>>, %arg13: memref<1x128xf32, #tpu.memory_space<vmem>>, %arg14: memref<128x32xf32, #tpu.memory_space<vmem>>, %arg15: memref<1x32xf32, #tpu.memory_space<vmem>>, %arg16: memref<8x128xf32, #tpu.memory_space<vmem>>) attributes {dimension_semantics = [#tpu.dimension_semantics<parallel>], iteration_bounds = array<i64: 1>, scalar_prefetch = 0 : i64, scratch_operands = 0 : i64, tpu.core_type = #tpu.core_type<tc>, window_params = [{transform_indices = @transform_0, window_bounds = array<i64: 8, 32>}, {transform_indices = @transform_1, window_bounds = array<i64: 8, 32>}, {transform_indices = @transform_2, window_bounds = array<i64: 8, 32>}, {pipeline_mode = #tpu.pipeline_mode<synchronous>, transform_indices = @transform_3, window_bounds = array<i64: 32, 128>}, {pipeline_mode = #tpu.pipeline_mode<synchronous>, transform_indices = @transform_4, window_bounds = array<i64: 32, 128>}, {pipeline_mode = #tpu.pipeline_mode<synchronous>, transform_indices = @transform_5, window_bounds = array<i64: 1, 128>}, {pipeline_mode = #tpu.pipeline_mode<synchronous>, transform_indices = @transform_6, window_bounds = array<i64: 128, 32>}, {pipeline_mode = #tpu.pipeline_mode<synchronous>, transform_indices = @transform_7, window_bounds = array<i64: 1, 32>}, {pipeline_mode = #tpu.pipeline_mode<synchronous>, transform_indices = @transform_8, window_bounds = array<i64: 128, 32>}, {pipeline_mode = #tpu.pipeline_mode<synchronous>, transform_indices = @transform_9, window_bounds = array<i64: 1, 32>}, {pipeline_mode = #tpu.pipeline_mode<synchronous>, transform_indices = @transform_10, window_bounds = array<i64: 32, 128>}, {pipeline_mode = #tpu.pipeline_mode<synchronous>, transform_indices = @transform_11, window_bounds = array<i64: 32, 128>}, {pipeline_mode = #tpu.pipeline_mode<synchronous>, transform_indices = @transform_12, window_bounds = array<i64: 1, 128>}, {pipeline_mode = #tpu.pipeline_mode<synchronous>, transform_indices = @transform_13, window_bounds = array<i64: 128, 32>}, {pipeline_mode = #tpu.pipeline_mode<synchronous>, transform_indices = @transform_14, window_bounds = array<i64: 1, 32>}, {transform_indices = @transform_15, window_bounds = array<i64: 8, 128>}]} {
    %c0 = arith.constant 0 : index
    %c0_0 = arith.constant 0 : index
    %0 = vector.load %arg1[%c0, %c0_0] : memref<8x32xf32, #tpu.memory_space<vmem>>, vector<8x32xf32>
    %c0_1 = arith.constant 0 : index
    %c0_2 = arith.constant 0 : index
    %1 = vector.load %arg2[%c0_1, %c0_2] : memref<8x32xf32, #tpu.memory_space<vmem>>, vector<8x32xf32>
    %c0_3 = arith.constant 0 : index
    %c0_4 = arith.constant 0 : index
    %2 = vector.load %arg3[%c0_3, %c0_4] : memref<8x32xf32, #tpu.memory_space<vmem>>, vector<8x32xf32>
    %c0_5 = arith.constant 0 : index
    %c0_6 = arith.constant 0 : index
    %3 = vector.load %arg4[%c0_5, %c0_6] : memref<32x128xf32, #tpu.memory_space<vmem>>, vector<32x128xf32>
    %cst = arith.constant dense<0.000000e+00> : vector<8x128xf32>
    %4 = tpu.matmul %0, %3, %cst {dimension_numbers = #tpu.dot_dimension_numbers<[1], [0], [0], [1], [0, 0, 1, 1], [], []>} : vector<8x32xf32>, vector<32x128xf32>, vector<8x128xf32> -> vector<8x128xf32>
    %c0_7 = arith.constant 0 : index
    %c0_8 = arith.constant 0 : index
    %5 = vector.load %arg5[%c0_7, %c0_8] : memref<32x128xf32, #tpu.memory_space<vmem>>, vector<32x128xf32>
    %cst_9 = arith.constant dense<0.000000e+00> : vector<8x128xf32>
    %6 = tpu.matmul %1, %5, %cst_9 {dimension_numbers = #tpu.dot_dimension_numbers<[1], [0], [0], [1], [0, 0, 1, 1], [], []>} : vector<8x32xf32>, vector<32x128xf32>, vector<8x128xf32> -> vector<8x128xf32>
    %7 = arith.addf %4, %6 : vector<8x128xf32>
    %c0_10 = arith.constant 0 : index
    %c0_11 = arith.constant 0 : index
    %8 = vector.load %arg6[%c0_10, %c0_11] : memref<1x128xf32, #tpu.memory_space<vmem>>, vector<1x128xf32>
    %9 = vector.broadcast %8 : vector<1x128xf32> to vector<8x128xf32>
    %10 = arith.addf %7, %9 : vector<8x128xf32>
    %cst_12 = arith.constant 0.000000e+00 : f32
    %11 = vector.broadcast %cst_12 : f32 to vector<8x128xf32>
    %12 = arith.maximumf %10, %11 : vector<8x128xf32>
    %c0_13 = arith.constant 0 : index
    %c0_14 = arith.constant 0 : index
    %13 = vector.load %arg7[%c0_13, %c0_14] : memref<128x32xf32, #tpu.memory_space<vmem>>, vector<128x32xf32>
    %cst_15 = arith.constant dense<0.000000e+00> : vector<8x32xf32>
    %14 = tpu.matmul %12, %13, %cst_15 {dimension_numbers = #tpu.dot_dimension_numbers<[1], [0], [0], [1], [0, 0, 1, 1], [], []>} : vector<8x128xf32>, vector<128x32xf32>, vector<8x32xf32> -> vector<8x32xf32>
    %c0_16 = arith.constant 0 : index
    %c0_17 = arith.constant 0 : index
    %15 = vector.load %arg8[%c0_16, %c0_17] : memref<1x32xf32, #tpu.memory_space<vmem>>, vector<1x32xf32>
    %16 = vector.broadcast %15 : vector<1x32xf32> to vector<8x32xf32>
    %17 = arith.addf %14, %16 : vector<8x32xf32>
    %c0_18 = arith.constant 0 : index
    %c0_19 = arith.constant 0 : index
    %18 = vector.load %arg9[%c0_18, %c0_19] : memref<128x32xf32, #tpu.memory_space<vmem>>, vector<128x32xf32>
    %cst_20 = arith.constant dense<0.000000e+00> : vector<8x32xf32>
    %19 = tpu.matmul %12, %18, %cst_20 {dimension_numbers = #tpu.dot_dimension_numbers<[1], [0], [0], [1], [0, 0, 1, 1], [], []>} : vector<8x128xf32>, vector<128x32xf32>, vector<8x32xf32> -> vector<8x32xf32>
    %c0_21 = arith.constant 0 : index
    %c0_22 = arith.constant 0 : index
    %20 = vector.load %arg10[%c0_21, %c0_22] : memref<1x32xf32, #tpu.memory_space<vmem>>, vector<1x32xf32>
    %21 = vector.broadcast %20 : vector<1x32xf32> to vector<8x32xf32>
    %22 = arith.addf %19, %21 : vector<8x32xf32>
    %cst_23 = arith.constant 5.000000e-01 : f32
    %23 = vector.broadcast %cst_23 : f32 to vector<8x32xf32>
    %24 = arith.mulf %23, %22 : vector<8x32xf32>
    %25 = math.exp %24 : vector<8x32xf32>
    %26 = arith.mulf %25, %2 : vector<8x32xf32>
    %27 = arith.addf %26, %17 : vector<8x32xf32>
    %c0_24 = arith.constant 0 : index
    %c0_25 = arith.constant 0 : index
    %28 = vector.load %arg11[%c0_24, %c0_25] : memref<32x128xf32, #tpu.memory_space<vmem>>, vector<32x128xf32>
    %cst_26 = arith.constant dense<0.000000e+00> : vector<8x128xf32>
    %29 = tpu.matmul %27, %28, %cst_26 {dimension_numbers = #tpu.dot_dimension_numbers<[1], [0], [0], [1], [0, 0, 1, 1], [], []>} : vector<8x32xf32>, vector<32x128xf32>, vector<8x128xf32> -> vector<8x128xf32>
    %c0_27 = arith.constant 0 : index
    %c0_28 = arith.constant 0 : index
    %30 = vector.load %arg12[%c0_27, %c0_28] : memref<32x128xf32, #tpu.memory_space<vmem>>, vector<32x128xf32>
    %cst_29 = arith.constant dense<0.000000e+00> : vector<8x128xf32>
    %31 = tpu.matmul %1, %30, %cst_29 {dimension_numbers = #tpu.dot_dimension_numbers<[1], [0], [0], [1], [0, 0, 1, 1], [], []>} : vector<8x32xf32>, vector<32x128xf32>, vector<8x128xf32> -> vector<8x128xf32>
    %32 = arith.addf %29, %31 : vector<8x128xf32>
    %c0_30 = arith.constant 0 : index
    %c0_31 = arith.constant 0 : index
    %33 = vector.load %arg13[%c0_30, %c0_31] : memref<1x128xf32, #tpu.memory_space<vmem>>, vector<1x128xf32>
    %34 = vector.broadcast %33 : vector<1x128xf32> to vector<8x128xf32>
    %35 = arith.addf %32, %34 : vector<8x128xf32>
    %cst_32 = arith.constant 0.000000e+00 : f32
    %36 = vector.broadcast %cst_32 : f32 to vector<8x128xf32>
    %37 = arith.maximumf %35, %36 : vector<8x128xf32>
    %c0_33 = arith.constant 0 : index
    %c0_34 = arith.constant 0 : index
    %38 = vector.load %arg14[%c0_33, %c0_34] : memref<128x32xf32, #tpu.memory_space<vmem>>, vector<128x32xf32>
    %cst_35 = arith.constant dense<0.000000e+00> : vector<8x32xf32>
    %39 = tpu.matmul %37, %38, %cst_35 {dimension_numbers = #tpu.dot_dimension_numbers<[1], [0], [0], [1], [0, 0, 1, 1], [], []>} : vector<8x128xf32>, vector<128x32xf32>, vector<8x32xf32> -> vector<8x32xf32>
    %c0_36 = arith.constant 0 : index
    %c0_37 = arith.constant 0 : index
    %40 = vector.load %arg15[%c0_36, %c0_37] : memref<1x32xf32, #tpu.memory_space<vmem>>, vector<1x32xf32>
    %41 = vector.broadcast %40 : vector<1x32xf32> to vector<8x32xf32>
    %42 = arith.addf %39, %41 : vector<8x32xf32>
    %43 = tpu.concatenate %42, %17, %22, %27 in 1 : vector<8x32xf32>, vector<8x32xf32>, vector<8x32xf32>, vector<8x32xf32> -> vector<8x128xf32>
    %c0_38 = arith.constant 0 : index
    %c0_39 = arith.constant 0 : index
    %44 = vector.load %arg16[%c0_38, %c0_39] : memref<8x128xf32, #tpu.memory_space<vmem>>, vector<8x128xf32>
    tpu.vector_store %arg16[%c0_38, %c0_39], %43 {strides = array<i32>} : memref<8x128xf32, #tpu.memory_space<vmem>>, vector<8x128xf32>,
    return
  }
  func.func @transform_0(%arg0: i32) -> (i32, i32) {
    %c0_i32 = arith.constant 0 : i32
    %c0_i32_0 = arith.constant 0 : i32
    return %arg0, %c0_i32 : i32, i32
  }
  func.func @transform_1(%arg0: i32) -> (i32, i32) {
    %c0_i32 = arith.constant 0 : i32
    %c0_i32_0 = arith.constant 0 : i32
    return %arg0, %c0_i32 : i32, i32
  }
  func.func @transform_2(%arg0: i32) -> (i32, i32) {
    %c0_i32 = arith.constant 0 : i32
    %c0_i32_0 = arith.constant 0 : i32
    return %arg0, %c0_i32 : i32, i32
  }
  func.func @transform_3(%arg0: i32) -> (i32, i32) {
    %c0_i32 = arith.constant 0 : i32
    %c0_i32_0 = arith.constant 0 : i32
    %c0_i32_1 = arith.constant 0 : i32
    return %c0_i32, %c0_i32_0 : i32, i32
  }
  func.func @transform_4(%arg0: i32) -> (i32, i32) {
    %c0_i32 = arith.constant 0 : i32
    %c0_i32_0 = arith.constant 0 : i32
    %c0_i32_1 = arith.constant 0 : i32
    return %c0_i32, %c0_i32_0 : i32, i32
  }
  func.func @transform_5(%arg0: i32) -> (i32, i32) {
    %c0_i32 = arith.constant 0 : i32
    %c0_i32_0 = arith.constant 0 : i32
    %c0_i32_1 = arith.constant 0 : i32
    return %c0_i32, %c0_i32_0 : i32, i32
  }
  func.func @transform_6(%arg0: i32) -> (i32, i32) {
    %c0_i32 = arith.constant 0 : i32
    %c0_i32_0 = arith.constant 0 : i32
    %c0_i32_1 = arith.constant 0 : i32
    return %c0_i32, %c0_i32_0 : i32, i32
  }
  func.func @transform_7(%arg0: i32) -> (i32, i32) {
    %c0_i32 = arith.constant 0 : i32
    %c0_i32_0 = arith.constant 0 : i32
    %c0_i32_1 = arith.constant 0 : i32
    return %c0_i32, %c0_i32_0 : i32, i32
  }
  func.func @transform_8(%arg0: i32) -> (i32, i32) {
    %c0_i32 = arith.constant 0 : i32
    %c0_i32_0 = arith.constant 0 : i32
    %c0_i32_1 = arith.constant 0 : i32
    return %c0_i32, %c0_i32_0 : i32, i32
  }
  func.func @transform_9(%arg0: i32) -> (i32, i32) {
    %c0_i32 = arith.constant 0 : i32
    %c0_i32_0 = arith.constant 0 : i32
    %c0_i32_1 = arith.constant 0 : i32
    return %c0_i32, %c0_i32_0 : i32, i32
  }
  func.func @transform_10(%arg0: i32) -> (i32, i32) {
    %c0_i32 = arith.constant 0 : i32
    %c0_i32_0 = arith.constant 0 : i32
    %c0_i32_1 = arith.constant 0 : i32
    return %c0_i32, %c0_i32_0 : i32, i32
  }
  func.func @transform_11(%arg0: i32) -> (i32, i32) {
    %c0_i32 = arith.constant 0 : i32
    %c0_i32_0 = arith.constant 0 : i32
    %c0_i32_1 = arith.constant 0 : i32
    return %c0_i32, %c0_i32_0 : i32, i32
  }
  func.func @transform_12(%arg0: i32) -> (i32, i32) {
    %c0_i32 = arith.constant 0 : i32
    %c0_i32_0 = arith.constant 0 : i32
    %c0_i32_1 = arith.constant 0 : i32
    return %c0_i32, %c0_i32_0 : i32, i32
  }
  func.func @transform_13(%arg0: i32) -> (i32, i32) {
    %c0_i32 = arith.constant 0 : i32
    %c0_i32_0 = arith.constant 0 : i32
    %c0_i32_1 = arith.constant 0 : i32
    return %c0_i32, %c0_i32_0 : i32, i32
  }
  func.func @transform_14(%arg0: i32) -> (i32, i32) {
    %c0_i32 = arith.constant 0 : i32
    %c0_i32_0 = arith.constant 0 : i32
    %c0_i32_1 = arith.constant 0 : i32
    return %c0_i32, %c0_i32_0 : i32, i32
  }
  func.func @transform_15(%arg0: i32) -> (i32, i32) {
    %c0_i32 = arith.constant 0 : i32
    %c0_i32_0 = arith.constant 0 : i32
    return %arg0, %c0_i32 : i32, i32
  }
}

</mosaic_0001>

<bundles_post_ra>
// kernel: tpu_custom_call.1
= control target key start
LH: loop header
LB: loop body
LE: loop exit
PB: predicated region body
PF: predicated region fallthrough
CT: control target
= control target key end

     0   :  { %v1051_v3 = vmov 0.0|0.0   ;;  %vm1052_vm0 = vmmov 0   ;;  %v1053_v6 = vmov 0.0   ;;  %vm62_vm1 = vcmask 261120   ;;  %s1421_s0 = inlined_call_operand.vmem [shape: f32[8,32], index: 0, kind: input, shape index: {}]   ;;  %s1422_s1 = inlined_call_operand.vmem [shape: f32[8,32], index: 1, kind: input, shape index: {}]   ;;  %s1423_s2 = inlined_call_operand.vmem [shape: f32[8,32], index: 2, kind: input, shape index: {}]   ;;  %s1424_s3 = inlined_call_operand.vmem [shape: f32[32,128], index: 3, kind: input, shape index: {}]   ;;  %s1425_s4 = inlined_call_operand.vmem [shape: f32[32,128], index: 4, kind: input, shape index: {}]   ;;  %s1426_s5 = inlined_call_operand.vmem [shape: f32[1,128], index: 5, kind: input, shape index: {}]   ;;  %s1427_s6 = inlined_call_operand.vmem [shape: f32[128,32], index: 6, kind: input, shape index: {}]   ;;  %s1428_s7 = inlined_call_operand.vmem [shape: f32[1,32], index: 7, kind: input, shape index: {}]   ;;  %s1429_s8 = inlined_call_operand.vmem [shape: f32[128,32], index: 8, kind: input, shape index: {}]   ;;  %s1430_s9 = inlined_call_operand.vmem [shape: f32[1,32], index: 9, kind: input, shape index: {}]   ;;  %s1431_s10 = inlined_call_operand.vmem [shape: f32[32,128], index: 10, kind: input, shape index: {}]   ;;  %s1432_s11 = inlined_call_operand.vmem [shape: f32[32,128], index: 11, kind: input, shape index: {}]   ;;  %s1433_s12 = inlined_call_operand.vmem [shape: f32[1,128], index: 12, kind: input, shape index: {}]   ;;  %s1434_s13 = inlined_call_operand.vmem [shape: f32[128,32], index: 13, kind: input, shape index: {}]   ;;  %s1435_s14 = inlined_call_operand.vmem [shape: f32[1,32], index: 14, kind: input, shape index: {}]   ;;  %s1436_s15 = inlined_call_operand.hbm [shape: f32[8,128], index: 15, kind: output, shape index: {}]  }
   0x1   :  { %v58_v0 = vld [vmem:[%s1425_s4] sm:$0xff]  ;;  %v59_v1 = vld [vmem:[%s1425_s4 + $0x8] sm:$0xff]  ;;  %v60_v2 = vld [vmem:[%s1425_s4 + $0x10] sm:$0xff]  ;;  %922 = vmatprep.subr.bf16.mxu1 %v1051_v3  ;;  %781 = vmatprep.mubr.msk.f32.mxu1 %vm1052_vm0, %v1053_v6 }
   0x2   :  { %v923_v4 = vpack.c.bf16 %v59_v1, %v58_v0  ;;  %v61_v5 = vld [vmem:[%s1425_s4 + $0x18] sm:$0xff]  ;;  %934 = vmatprep.subr.bf16.mxu0 %v1051_v3  ;;  %827 = vmatprep.mubr.msk.f32.mxu0 %vm1052_vm0, %v1053_v6  ;;  %v218_v8 = vld [vmem:[%s1427_s6] sm:$0xff]  ;;  %v219_v9 = vld [vmem:[%s1427_s6 + $0x8] sm:$0xff] }
   0x3   :  { %v926_v7 = vpack.c.bf16 %v61_v5, %v60_v2  ;;  %v54_v10 = vld [vmem:[%s1424_s3] sm:$0xff]  ;;  %v55_v11 = vld [vmem:[%s1424_s3 + $0x8] sm:$0xff]  ;;  %v935_v12 = vpack.c.bf16 %v219_v9, %v218_v8  ;;  %v220_v13 = vld [vmem:[%s1427_s6 + $0x10] sm:$0xff] }
   0x4   :  { %924 = vmatpush3.bf16.msra.mxu1 %v923_v4  ;;  %v221_v14 = vld [vmem:[%s1427_s6 + $0x18] sm:$0xff]  ;;  %v1178_v16 = vld [vmem:[%s1422_s1] sm:$0xff]  ;;  %v929_v17 = vpack.c.bf16 %v55_v11, %v54_v10  ;;  %v223_v19 = vld [vmem:[%s1427_s6 + $0x28] sm:$0xff] }
   0x5   :  { %925 = vmatprep.subr.bf16.mxu1 %v1051_v3  ;;  %936 = vmatpush3.bf16.msra.mxu0 %v935_v12  ;;  %v938_v15 = vpack.c.bf16 %v221_v14, %v220_v13  ;;  %v222_v18 = vld [vmem:[%s1427_s6 + $0x20] sm:$0xff]  ;;  %v56_v20 = vld [vmem:[%s1424_s3 + $0x10] sm:$0xff]  ;;  %v57_v21 = vld [vmem:[%s1424_s3 + $0x18] sm:$0xff] }
   0x6   :  { %937 = vmatprep.subr.bf16.mxu0 %v1051_v3 }
   0x8   :  { %927 = vmatpush3.bf16.msra.mxu1 %v926_v7 }
   0x9   :  { %928 = vmatprep.subr.bf16.mxu1 %v1051_v3 }
   0xa   :  { %20 = vsyncpa [#allocation3], 0  ;;  %939 = vmatpush3.bf16.msra.mxu0 %v938_v15  ;;  %v941_v22 = vpack.c.bf16 %v223_v19, %v222_v18  ;;  %v932_v23 = vpack.c.bf16 %v57_v21, %v56_v20  ;;  %v224_v24 = vld [vmem:[%s1427_s6 + $0x30] sm:$0xff]  ;;  %v225_v25 = vld [vmem:[%s1427_s6 + $0x38] sm:$0xff]  ;;  %s1055_s28 = smov 64   ;;  %s1056_s26 = smov 96  }
   0xb   :  { %782 = vmatmul.mubr.msk.f32.vlgmr.msra.gmra.mrb[0].mxu1 %vm62_vm1, %v1178_v16  ;;  %v311_v26 = vld [vmem:[%s1429_s8] sm:$0xff]  ;;  %v312_v27 = vld [vmem:[%s1429_s8 + $0x8] sm:$0xff]  ;;  %940 = vmatprep.subr.bf16.mxu0 %v1051_v3  ;;  %v944_v28 = vpack.c.bf16 %v225_v25, %v224_v24  ;;  %v313_v31 = vld [vmem:[%s1429_s8 + $0x10] sm:$0xff]  ;;  %vm674_vm2 = vcmask 523264   ;;  %vm676_vm3 = vcmask 785408  }
   0xc   :  { %930 = vmatpush3.bf16.msra.mxu1 %v929_v17  ;;  %792 = vmatprep.mubr.msk.f32.mxu1 %vm1052_vm0, %v1053_v6  ;;  %v51_v29 = vld [vmem:[%s1421_s0] sm:$0xff]  ;;  %v959_v30 = vpack.c.bf16 %v312_v27, %v311_v26  ;;  %v314_v32 = vld [vmem:[%s1429_s8 + $0x18] sm:$0xff]  ;;  %v316_v35 = vld [vmem:[%s1429_s8 + $0x28] sm:$0xff] }
   0xd   :  { %931 = vmatprep.subr.bf16.mxu1 %v1051_v3  ;;  %v962_v33 = vpack.c.bf16 %v314_v32, %v313_v31  ;;  %v315_v34 = vld [vmem:[%s1429_s8 + $0x20] sm:$0xff]  ;;  %v317_v37 = vld [vmem:[%s1429_s8 + $0x30] sm:$0xff]  ;;  %v318_v38 = vld [vmem:[%s1429_s8 + $0x38] sm:$0xff] }
   0xe   :  { %942 = vmatpush3.bf16.msra.mxu0 %v941_v22  ;;  %v965_v36 = vpack.c.bf16 %v316_v35, %v315_v34  ;;  %v968_v39 = vpack.c.bf16 %v318_v38, %v317_v37  ;;  %v226_v40 = vld [vmem:[%s1427_s6 + $0x40] sm:$0xff]  ;;  %v227_v41 = vld [vmem:[%s1427_s6 + $0x48] sm:$0xff]  ;;  %v228_v46 = vld [vmem:[%s1427_s6 + $0x50] sm:$0xff] }
   0xf   :  { %943 = vmatprep.subr.bf16.mxu0 %v1051_v3  ;;  %v319_v42 = vld [vmem:[%s1429_s8 + $0x40] sm:$0xff]  ;;  %v947_v43 = vpack.c.bf16 %v227_v41, %v226_v40  ;;  %v320_v44 = vld [vmem:[%s1429_s8 + $0x48] sm:$0xff]  ;;  %v229_v47 = vld [vmem:[%s1427_s6 + $0x58] sm:$0xff] }
  0x10   :  { %933 = vmatpush3.bf16.msra.mxu1 %v932_v23  ;;  %v971_v45 = vpack.c.bf16 %v320_v44, %v319_v42  ;;  %v321_v48 = vld [vmem:[%s1429_s8 + $0x50] sm:$0xff]  ;;  %v950_v49 = vpack.c.bf16 %v229_v47, %v228_v46  ;;  %v322_v50 = vld [vmem:[%s1429_s8 + $0x58] sm:$0xff]  ;;  %v230_v52 = vld [vmem:[%s1427_s6 + $0x60] sm:$0xff] }
  0x11   :  { %958 = vmatprep.subr.bf16.mxu1 %v1051_v3  ;;  %v974_v51 = vpack.c.bf16 %v322_v50, %v321_v48  ;;  %v231_v53 = vld [vmem:[%s1427_s6 + $0x68] sm:$0xff]  ;;  %v323_v54 = vld [vmem:[%s1429_s8 + $0x60] sm:$0xff]  ;;  %v232_v58 = vld [vmem:[%s1427_s6 + $0x70] sm:$0xff] }
  0x12   :  { %945 = vmatpush3.bf16.msra.mxu0 %v944_v28  ;;  %v953_v55 = vpack.c.bf16 %v231_v53, %v230_v52  ;;  %v324_v56 = vld [vmem:[%s1429_s8 + $0x68] sm:$0xff]  ;;  %v233_v59 = vld [vmem:[%s1427_s6 + $0x78] sm:$0xff]  ;;  %v325_v61 = vld [vmem:[%s1429_s8 + $0x70] sm:$0xff] }
  0x13   :  { %793 = vmatmul.mubr.msk.f32.vlgmr.msra.gmra.mrb[2].mxu1 %vm62_vm1, %v51_v29  ;;  %946 = vmatprep.subr.bf16.mxu0 %v1051_v3  ;;  %v977_v57 = vpack.c.bf16 %v324_v56, %v323_v54  ;;  %v956_v60 = vpack.c.bf16 %v233_v59, %v232_v58  ;;  %v326_v62 = vld [vmem:[%s1429_s8 + $0x78] sm:$0xff]  ;;  %v695_v4 = vld [vmem:[%s1426_s5] ss:$0 sm:$0xff]  ;;  %v414_v11 = vld [vmem:[%s1432_s11 + $0x8] sm:$0xff] }
  0x14   :  { %960 = vmatpush3.bf16.msra.mxu1 %v959_v30  ;;  %862 = vmatprep.mubr.msk.f32.mxu1 %vm1052_vm0, %v1053_v6  ;;  %v980_v63 = vpack.c.bf16 %v326_v62, %v325_v61  ;;  %v413_v10 = vld [vmem:[%s1432_s11] sm:$0xff]  ;;  %v415_v13 = vld [vmem:[%s1432_s11 + $0x10] sm:$0xff]  ;;  %v416_v14 = vld [vmem:[%s1432_s11 + $0x18] sm:$0xff] }
  0x15   :  { %961 = vmatprep.subr.bf16.mxu1 %v1051_v3  ;;  %v983_v12 = vpack.c.bf16 %v414_v11, %v413_v10  ;;  %v986_v15 = vpack.c.bf16 %v416_v14, %v415_v13  ;;  %v409_v17 = vld [vmem:[%s1431_s10] sm:$0xff]  ;;  %v410_v18 = vld [vmem:[%s1431_s10 + $0x8] sm:$0xff]  ;;  %v411_v20 = vld [vmem:[%s1431_s10 + $0x10] sm:$0xff] }
  0x16   :  { %948 = vmatpush3.bf16.msra.mxu0 %v947_v43  ;;  %v989_v19 = vpack.c.bf16 %v410_v18, %v409_v17  ;;  %v412_v21 = vld [vmem:[%s1431_s10 + $0x18] sm:$0xff]  ;;  %v696_v23 = vld [vmem:[%s1428_s7] ss:$0 sm:$0xff]  ;;  %s1054_s10 = smov 32   ;;  %v570_v32 = vld [vmem:[%s1434_s13 + $0x8] sm:$0xff] }
  0x17   :  { %949 = vmatprep.subr.bf16.mxu0 %v1051_v3  ;;  %v992_v22 = vpack.c.bf16 %v412_v21, %v411_v20  ;;  %v697_v24 = vld [vmem:[%s1430_s9] ss:$0 sm:$0xff]  ;;  %v572_v35 = vld [vmem:[%s1434_s13 + $0x18] sm:$0xff]  ;;  %v574_v38 = vld [vmem:[%s1434_s13 + $0x28] sm:$0xff] }
  0x18   :  { %963 = vmatpush3.bf16.msra.mxu1 %v962_v33  ;;  %v569_v31 = vld [vmem:[%s1434_s13] sm:$0xff]  ;;  %v571_v33 = vld [vmem:[%s1434_s13 + $0x10] sm:$0xff]  ;;  %v576_v42 = vld [vmem:[%s1434_s13 + $0x38] sm:$0xff] }
  0x19   :  { %964 = vmatprep.subr.bf16.mxu1 %v1051_v3  ;;  %v995_v34 = vpack.c.bf16 %v570_v32, %v569_v31  ;;  %v573_v37 = vld [vmem:[%s1434_s13 + $0x20] sm:$0xff]  ;;  %v575_v41 = vld [vmem:[%s1434_s13 + $0x30] sm:$0xff]  ;;  %v578_v48 = vld [vmem:[%s1434_s13 + $0x48] sm:$0xff] }
  0x1a   :  { %951 = vmatpush3.bf16.msra.mxu0 %v950_v49  ;;  %v1001_v40 = vpack.c.bf16 %v574_v38, %v573_v37  ;;  %v577_v47 = vld [vmem:[%s1434_s13 + $0x40] sm:$0xff]  ;;  %v579_v50 = vld [vmem:[%s1434_s13 + $0x50] sm:$0xff]  ;;  %v582_v56 = vld [vmem:[%s1434_s13 + $0x68] sm:$0xff] }
  0x1b   :  { %952 = vmatprep.subr.bf16.mxu0 %v1051_v3  ;;  %v1007_v49 = vpack.c.bf16 %v578_v48, %v577_v47  ;;  %v583_v58 = vld [vmem:[%s1434_s13 + $0x70] sm:$0xff]  ;;  %v584_v59 = vld [vmem:[%s1434_s13 + $0x78] sm:$0xff]  ;;  %v700_v62 = vld [vmem:[%s1433_s12] ss:$0 sm:$0xff] }
  0x1c   :  { %966 = vmatpush3.bf16.msra.mxu1 %v965_v36  ;;  %v998_v36 = vpack.c.bf16 %v572_v35, %v571_v33 }
  0x1d   :  { %967 = vmatprep.subr.bf16.mxu1 %v1051_v3 }
  0x1e   :  { %954 = vmatpush3.bf16.msra.mxu0 %v953_v55  ;;  %v581_v55 = vld [vmem:[%s1434_s13 + $0x60] sm:$0xff] }
  0x1f   :  { %955 = vmatprep.subr.bf16.mxu0 %v1051_v3 }
  0x20   :  { %969 = vmatpush3.bf16.msra.mxu1 %v968_v39  ;;  %v53_v39 = vld [vmem:[%s1423_s2] sm:$0xff] }
  0x21   :  { %970 = vmatprep.subr.bf16.mxu1 %v1051_v3 }
  0x22   :  { %957 = vmatpush3.bf16.msra.mxu0 %v956_v60  ;;  %v1016_v60 = vpack.c.bf16 %v584_v59, %v583_v58 }
  0x23   :  { %994 = vmatprep.subr.bf16.mxu0 %v1051_v3 }
  0x24   :  { %972 = vmatpush3.bf16.msra.mxu1 %v971_v45  ;;  %v1004_v45 = vpack.c.bf16 %v576_v42, %v575_v41 }
  0x25   :  { %973 = vmatprep.subr.bf16.mxu1 %v1051_v3 }
  0x28   :  { %975 = vmatpush3.bf16.msra.mxu1 %v974_v51  ;;  %v580_v51 = vld [vmem:[%s1434_s13 + $0x58] sm:$0xff]  ;;  %s1057_s13 = smov [#allocation2]  }
  0x29   :  { %976 = vmatprep.subr.bf16.mxu1 %v1051_v3  ;;  %v1010_v52 = vpack.c.bf16 %v580_v51, %v579_v50  ;;  %s685_s3 = sshll.u32 %s1057_s13, 4  ;;  %s686_s3 = int_to_ptr.vmem [resolvable:$true] %s685_s3 }
  0x2a   :  { %s1027_s12 = scalar_lea.vmem %s686_s3, 128  ;;  %p1032_p1 = scmp.lt.s32.totalorder %s686_s3, %s686_s3 }
  0x2b   :  { %p1028_p0 = scmp.ne.s32.totalorder %s686_s3, %s1027_s12  ;;  %p1033_p2 = scmp.lt.s32.totalorder %s1027_s12, %s1027_s12 }
  0x2c   :  { %978 = vmatpush3.bf16.msra.mxu1 %v977_v57  ;;  %v1013_v57 = vpack.c.bf16 %v582_v56, %v581_v55 }
  0x2d   :  { %979 = vmatprep.subr.bf16.mxu1 %v1051_v3  ;;  %p1034_p3 = por %p1033_p2, %p1032_p1 }
  0x2f   :  { %p1035_p4 = pnand %p1034_p3, %p1028_p0 }
  0x30   :  { %981 = vmatpush3.bf16.msra.mxu1 %v980_v63 }
  0x31   :  { %982 = vmatprep.subr.bf16.mxu1 %v1051_v3 }
  0xde   :  { %v132_v0 = vpop.f32.mrb[0].mxu1 }
  0xdf   :  { %v783_v1 = vpop.f32.mrb[1].mxu1 }
  0xe6   :  { %v205_v2 = vpop.f32.mrb[2].mxu1 }
  0xe7   :  { %v206_v5 = vadd.f32 %v205_v2, %v132_v0  ;;  %v794_v7 = vpop.f32.mrb[3].mxu1 }
  0xe9   :  { %v216_v8 = vadd.f32 %v695_v4, %v206_v5  ;;  %v701_v4 = vld [vmem:[%s1435_s14] ss:$0 sm:$0xff] }
  0xeb   :  { %v217_v9 = vmax.f32 %v216_v8, 0.0 }
  0xed   :  { %828 = vmatmul.mubr.f32.vlgmr.msra.gmra.mrb[0].mxu0 %v217_v9  ;;  %863 = vmatmul.mubr.f32.vlgmr.msra.gmra.mrb[4].mxu1 %v217_v9 }
  0xee   :  { %873 = vmatprep.mubr.msk.f32.mxu1 %vm1052_vm0, %v1053_v6  ;;  %919 = vmatprep.mubr.msk.f32.mxu0 %vm1052_vm0, %v1053_v6 }
  0xef   :  { %984 = vmatpush3.bf16.msra.mxu1 %v983_v12  ;;  %996 = vmatpush3.bf16.msra.mxu0 %v995_v34 }
  0xf0   :  { %985 = vmatprep.subr.bf16.mxu1 %v1051_v3  ;;  %997 = vmatprep.subr.bf16.mxu0 %v1051_v3 }
  0xf3   :  { %987 = vmatpush3.bf16.msra.mxu1 %v986_v15  ;;  %999 = vmatpush3.bf16.msra.mxu0 %v998_v36 }
  0xf4   :  { %988 = vmatprep.subr.bf16.mxu1 %v1051_v3  ;;  %1000 = vmatprep.subr.bf16.mxu0 %v1051_v3 }
  0xf6   :  { %874 = vmatmul.mubr.msk.f32.vlgmr.msra.gmra.mrb[6].mxu1 %vm62_vm1, %v1178_v16 }
  0xf7   :  { %990 = vmatpush3.bf16.msra.mxu1 %v989_v19  ;;  %884 = vmatprep.mubr.msk.f32.mxu1 %vm1052_vm0, %v1053_v6 }
  0xf8   :  { %991 = vmatprep.subr.bf16.mxu1 %v1051_v3  ;;  %1002 = vmatpush3.bf16.msra.mxu0 %v1001_v40 }
  0xf9   :  { %1003 = vmatprep.subr.bf16.mxu0 %v1051_v3 }
  0xfb   :  { %993 = vmatpush3.bf16.msra.mxu1 %v992_v22 }
  0xfc   :  { %1005 = vmatpush3.bf16.msra.mxu0 %v1004_v45 }
  0xfd   :  { %1006 = vmatprep.subr.bf16.mxu0 %v1051_v3 }
 0x100   :  { %1008 = vmatpush3.bf16.msra.mxu0 %v1007_v49 }
 0x101   :  { %1009 = vmatprep.subr.bf16.mxu0 %v1051_v3 }
 0x104   :  { %1011 = vmatpush3.bf16.msra.mxu0 %v1010_v52 }
 0x105   :  { %1012 = vmatprep.subr.bf16.mxu0 %v1051_v3 }
 0x108   :  { %1014 = vmatpush3.bf16.msra.mxu0 %v1013_v57 }
 0x109   :  { %1015 = vmatprep.subr.bf16.mxu0 %v1051_v3 }
 0x10c   :  { %1017 = vmatpush3.bf16.msra.mxu0 %v1016_v60 }
 0x1c0   :  { %v307_v25 = vpop.f32.mrb[0].mxu0  ;;  %v400_v26 = vpop.f32.mrb[4].mxu1 }
 0x1c1   :  { %v308_v27 = vadd.f32 %v696_v23, %v307_v25  ;;  %v401_v16 = vadd.f32 %v697_v24, %v400_v26  ;;  %v829_v28 = vpop.f32.mrb[1].mxu0  ;;  %v864_v29 = vpop.f32.mrb[5].mxu1 }
 0x1c3   :  { %v404_v30 = vmul.f32 0.5, %v401_v16  ;;  %663 = vrot.lane.b32.xlu0 %v308_v27, %s1054_s10 }
 0x1c5   :  { %v405_v6 = vmul.f32 1.442695, %v404_v30 }
 0x1c7   :  { %1025 = vpow2.f32 %v405_v6  ;;  %667 = vrot.lane.b32.xlu0 %v401_v16, %s1055_s28 }
 0x1c9   :  { %v483_v53 = vpop.f32.mrb[6].mxu1 }
 0x1ca   :  { %v875_v54 = vpop.f32.mrb[7].mxu1 }
 0x1d1   :  { %v1026_v43 = vpop.eup %1025 }
 0x1d2   :  { %v407_v44 = vmul.f32 %v1026_v43, %v53_v39 }
 0x1d4   :  { %v408_v46 = vadd.f32 %v407_v44, %v308_v27 }
 0x1d6   :  { %670 = vrot.lane.b32.xlu1 %v408_v46, %s1056_s26  ;;  %885 = vmatmul.mubr.msk.f32.vlgmr.msra.gmra.mrb[8].mxu1 %vm62_vm1, %v408_v46 }
 0x235   :  { %v664_v3 = vpop.permute.xlu0 %663 }
 0x239   :  { %v668_v9 = vpop.permute.xlu0 %667 }
 0x248   :  { %v671_v11 = vpop.permute.xlu1 %670 }
 0x2a9   :  { %v556_v61 = vpop.f32.mrb[8].mxu1 }
 0x2aa   :  { %v557_v63 = vadd.f32 %v556_v61, %v483_v53  ;;  %v886_v0 = vpop.f32.mrb[9].mxu1 }
 0x2ac   :  { %v567_v1 = vadd.f32 %v700_v62, %v557_v63 }
 0x2ae   :  { %v568_v2 = vmax.f32 %v567_v1, 0.0 }
 0x2b0   :  { %920 = vmatmul.mubr.f32.vlgmr.msra.gmra.mrb[2].mxu0 %v568_v2 }
 0x383   :  { %v658_v5 = vpop.f32.mrb[2].mxu0 }
 0x384   :  { %v659_v7 = vadd.f32 %v701_v4, %v658_v5  ;;  %v921_v8 = vpop.f32.mrb[3].mxu0 }
 0x386   :  { %v673_v10 = vsel %vm62_vm1, %v659_v7, %v664_v3 }
 0x387   :  { %v675_v12 = vsel %vm674_vm2, %v673_v10, %v668_v9 }
 0x388   :  { %v677_v13 = vsel %vm676_vm3, %v675_v12, %v671_v11 }
 0x389   :  { %678 = vst [vmem:[#allocation2] sm:$0xff] %v677_v13 }
 0x38a   :  { %1038 = shalt.err (!%p1035_p4)
}
 0x38b   :  { %s1039_s20 = scalar_lea.hbm %s1436_s15, 128 }
 0x38c   :  { %p1040_p5 = scmp.ne.s32.totalorder %s1436_s15, %s1039_s20  ;;  %p1043_p6 = scmp.lt.u32.totalorder %s1039_s20, %s1436_s15 }
 0x38e   :  { %p1045_p7 = pnand %p1043_p6, %p1040_p5 }
 0x390   :  { %1048 = shalt.err (!%p1045_p7)
}
 0x391   :  { %688 = dma.vmem_to_hbm [thread:$0]  %s686_s3, 128, %s1436_s15, [#allocation3]  }
 0x392   :  { %1049 = dma.done.wait [#allocation3], 128  }
 0x393   :  { %1050 = vsyncadd [#allocation3], 4294967168 }
 0x394   :  { %692 = vsyncpa [#allocation3], 1 }

</bundles_post_ra>
